<compile_context>
chip_gen: v5e
topology: v5e:2x2
jax: 0.10.0
libtpu: 0.0.40
codegen_flags: <defaults>
</compile_context>

<pallas_src>
import jax
import jax.numpy as jnp
from jax.experimental import pallas as pl
from jax.experimental.pallas import tpu as pltpu


def _round_up(x, m):
    return ((x + m - 1) // m) * m


def _vmem_capacity_bytes():
    try:
        return int(pltpu.get_tpu_info().vmem_capacity_bytes)
    except Exception:
        return 64 * 1024 * 1024  # conservative fallback: v7x per-TensorCore VMEM


# ---------------------------------------------------------------------------
# Kernels
# ---------------------------------------------------------------------------
def _linear_kernel_single_k(x_ref, w_ref, b_ref, o_ref):
    # x_ref: (B_pad, D) fully resident; w_ref: (D, tn); b_ref: (1, tn) f32;
    # o_ref: (B_pad, tn).  Single K step: no accumulator scratch needed.
    acc = jnp.dot(x_ref[...], w_ref[...], preferred_element_type=jnp.float32)
    o_ref[...] = (acc + b_ref[...]).astype(o_ref.dtype)


def _linear_kernel_multi_k(x_ref, w_ref, b_ref, o_ref, acc_ref):
    # x_ref: (B_pad, D_pad) fully resident; w_ref: (tk, tn); b_ref: (1, tn) f32;
    # o_ref: (B_pad, tn); acc_ref: (B_pad, tn) f32 scratch living across the K axis.
    k = pl.program_id(1)
    tk = w_ref.shape[0]

    @pl.when(k == 0)
    def _():
        acc_ref[...] = jnp.zeros_like(acc_ref)

    x_tile = x_ref[:, pl.ds(pl.multiple_of(k * tk, tk), tk)]
    acc_ref[...] += jnp.dot(x_tile, w_ref[...], preferred_element_type=jnp.float32)

    @pl.when(k == pl.num_programs(1) - 1)
    def _():
        o_ref[...] = (acc_ref[...] + b_ref[...]).astype(o_ref.dtype)


# ---------------------------------------------------------------------------
# Tiling
# ---------------------------------------------------------------------------
def _pick_tiles(N, D, B_pad, x_bytes, w_bytes, out_bytes, budget):
    """Pick (tn, tk, weight_buffer_count) so per-step VMEM residents fit `budget`."""
    # K tiling only for very large embed_dim; prefer a divisor of D (no K padding).
    MAX_TK = 4096
    if D <= MAX_TK:
        tk = D
    else:
        tk = MAX_TK
        for cand in range(MAX_TK, 127, -128):
            if D % cand == 0:
                tk = cand
                break
    k_tiles = -(-D // tk)

    def residents(tn, w_bufs):
        r = (w_bufs * tk * tn * w_bytes                      # weight tiles (streamed)
             + 2 * B_pad * _round_up(D, tk) * x_bytes        # x resident (conservative 2x)
             + 2 * B_pad * tn * out_bytes                    # output tiles, double-buffered
             + 2 * tn * 4)                                   # bias tiles (f32)
        if k_tiles > 1:
            r += B_pad * tn * 4                              # f32 accumulator scratch
        return r

    N128 = _round_up(N, 128)
    if N128 <= 128:
        # Tiny output: one full-width tile (block == full dim is always legal).
        w_bufs = 3 if residents(N128, 3) <= budget else 2
        return N, tk, w_bufs

    tn_cap = min(N128, 2048)
    # Keep >= 2 N tiles so v7x's two TensorCores can both stream weights; costs only
    # one extra ~0.35us grid step on single-core v5e/v6e.
    tn_cap = min(tn_cap, _round_up((N128 + 1) // 2, 128))

    candidates = list(range(tn_cap, 127, -128))
    fitting = [t for t in candidates if residents(t, 2) <= budget] or [128]
    tn = fitting[0]
    for t in fitting:                      # prefer no ragged last tile
        if N % t == 0:
            tn = t
            break
    w_bufs = 3 if residents(tn, 3) <= budget else 2
    return tn, tk, w_bufs


# ---------------------------------------------------------------------------
# Parameter preparation (ONE-TIME, outside the hot path)
# ---------------------------------------------------------------------------
def prepare_pixel_classifier_params(weight, bias, *, compute_dtype=jnp.bfloat16):
    """One-time parameter preparation; do NOT call per forward pass.

    weight: (image_size**2, embed_dim)  -- nn.Linear (out, in) layout.
    bias:   (image_size**2,)
    Returns (w_dn, bias_f32): weight transposed to (embed_dim, N) and cast to
    `compute_dtype` (default bf16 streaming; pass None for the f32-exact path),
    bias kept in f32 for the epilogue add.
    """
    w_dn = jnp.asarray(weight).T                      # (D, N): plain row-major contraction
    if compute_dtype is not None:
        w_dn = w_dn.astype(compute_dtype)
    # TODO(synk): optional quantized-weight path (fp8-e4m3 on v7x, int8 on v5e/v6e) with
    # per-output-channel scales folded into the epilogue would halve HBM bytes again.
    return w_dn, jnp.asarray(bias).astype(jnp.float32)


# ---------------------------------------------------------------------------
# Forward
# ---------------------------------------------------------------------------
def pixel_classifier_forward(image_features, w_dn, bias, image_size):
    """image_features: (B, embed_dim) (trailing dims flattened, like .view(B, -1));
    w_dn: (embed_dim, image_size**2) from prepare_pixel_classifier_params;
    bias: (image_size**2,) f32.  Returns (B, image_size, image_size) in the input dtype."""
    out_dtype = image_features.dtype
    B = image_features.shape[0]
    x = image_features.reshape(B, -1)                 # .view(B, -1)
    D, N = w_dn.shape
    assert x.shape[1] == D and N == image_size * image_size and bias.shape == (N,)

    compute_dtype = w_dn.dtype                        # streaming dtype set once in prepare()
    x = x.astype(compute_dtype)
    x_bytes = jnp.dtype(compute_dtype).itemsize
    out_bytes = jnp.dtype(out_dtype).itemsize

    # Pad batch to a full sublane group (8 rows f32 / 16 rows bf16) -> unmasked stores.
    b_mult = 16 if x_bytes == 2 else 8
    B_pad = _round_up(B, b_mult)
    if B_pad != B:
        x = jnp.pad(x, ((0, B_pad - B), (0, 0)))

    cap = _vmem_capacity_bytes()
    budget = int(0.4 * cap)                           # residents budget (generation-aware)
    vmem_limit = int(0.75 * cap)
    tn, tk, w_bufs = _pick_tiles(N, D, B_pad, x_bytes, x_bytes, out_bytes, budget)

    if D % tk != 0:
        # Only when embed_dim > 4096 with no 128-multiple divisor: zero-pad K (rare).
        D_pad = _round_up(D, tk)
        x = jnp.pad(x, ((0, 0), (0, D_pad - D)))
        w_dn = jnp.pad(w_dn, ((0, D_pad - D), (0, 0)))
        D = D_pad

    n_tiles = -(-N // tn)                             # ragged last tile -> masked writes
    k_tiles = D // tk
    b2d = bias.reshape(1, N).astype(jnp.float32)

    def call(weight_bufs):
        def w_spec(shape, index_map):
            if weight_bufs > 2:
                return pl.BlockSpec(shape, index_map, pipeline_mode=pl.Buffered(weight_bufs))
            return pl.BlockSpec(shape, index_map)

        if k_tiles == 1:
            grid_spec = pltpu.PrefetchScalarGridSpec(
                num_scalar_prefetch=0,
                grid=(n_tiles,),
                in_specs=[
                    pl.BlockSpec((B_pad, D), lambda j: (0, 0)),   # x: resident, DMA'd once
                    w_spec((D, tn), lambda j: (0, j)),            # W in (D, N) layout
                    pl.BlockSpec((1, tn), lambda j: (0, j)),      # bias
                ],
                out_specs=pl.BlockSpec((B_pad, tn), lambda j: (0, j)),
            )
            kernel = _linear_kernel_single_k
            semantics = ("parallel",)
        else:
            grid_spec = pltpu.PrefetchScalarGridSpec(
                num_scalar_prefetch=0,
                grid=(n_tiles, k_tiles),
                in_specs=[
                    pl.BlockSpec((B_pad, D), lambda j, k: (0, 0)),
                    w_spec((tk, tn), lambda j, k: (k, j)),
                    pl.BlockSpec((1, tn), lambda j, k: (0, j)),
                ],
                out_specs=pl.BlockSpec((B_pad, tn), lambda j, k: (0, j)),
                scratch_shapes=[pltpu.VMEM((B_pad, tn), jnp.float32)],
            )
            kernel = _linear_kernel_multi_k
            semantics = ("parallel", "arbitrary")

        return pl.pallas_call(
            kernel,
            out_shape=jax.ShapeDtypeStruct((B_pad, N), out_dtype),
            grid_spec=grid_spec,
            compiler_params=pltpu.CompilerParams(
                dimension_semantics=semantics,
                vmem_limit_bytes=vmem_limit,
            ),
        )(x, w_dn, b2d)

    if w_bufs > 2:
        try:
            out = call(w_bufs)
        except Exception:
            # pipeline_mode=pl.Buffered unsupported in this build -> default double-buffering.
            out = call(2)
    else:
        out = call(2)

    return out[:B].reshape(B, image_size, image_size)


# ---------------------------------------------------------------------------
# Self-test
# ---------------------------------------------------------------------------
if __name__ == "__main__":
    # Small shapes consistent with the module: batch=2, embed_dim=32, image_size=16.
    B, embed_dim, image_size = 2, 32, 16
    N = image_size * image_size
    key = jax.random.PRNGKey(0)
    kx, kw, kb = jax.random.split(key, 3)

    image_features = jax.random.normal(kx, (B, embed_dim), dtype=jnp.float32)
    # nn.Linear(embed_dim, image_size**2) parameter shapes (out, in) and (out,).
    weight = jax.random.normal(kw, (N, embed_dim), dtype=jnp.float32) * 0.02
    bias = jax.random.normal(kb, (N,), dtype=jnp.float32) * 0.02

    # Reference in plain JAX (same math as the PyTorch module).
    ref = (image_features.reshape(B, -1) @ weight.T + bias).reshape(B, image_size, image_size)

    # Default path: bf16 weight/activation streaming (one-time cast + transpose), f32 accumulation.
    w_bf16, b_prep = prepare_pixel_classifier_params(weight, bias)
    out_bf16 = pixel_classifier_forward(image_features, w_bf16, b_prep, image_size)
    out_bf16 = jax.block_until_ready(out_bf16)
    assert out_bf16.shape == (B, image_size, image_size)
    assert jnp.allclose(out_bf16, ref, atol=5e-2, rtol=5e-2)

    # f32-exact path for callers that need it.
    w_f32, b_prep32 = prepare_pixel_classifier_params(weight, bias, compute_dtype=None)
    out_f32 = pixel_classifier_forward(image_features, w_f32, b_prep32, image_size)
    out_f32 = jax.block_until_ready(out_f32)
    assert jnp.allclose(out_f32, ref, atol=1e-5, rtol=1e-5)

    print("KERNEL_OK")
</pallas_src>

<mosaic_0001>
module attributes {stable_mosaic.version = 11 : i64} {
  func.func @_linear_kernel_single_k(%arg0: i32, %arg1: memref<16x32xbf16, #tpu.memory_space<vmem>>, %arg2: memref<32x128xbf16, #tpu.memory_space<vmem>>, %arg3: memref<1x128xf32, #tpu.memory_space<vmem>>, %arg4: memref<16x128xf32, #tpu.memory_space<vmem>>) attributes {dimension_semantics = [#tpu.dimension_semantics<parallel>], iteration_bounds = array<i64: 2>, scalar_prefetch = 0 : i64, scratch_operands = 0 : i64, tpu.core_type = #tpu.core_type<tc>, window_params = [{pipeline_mode = #tpu.pipeline_mode<synchronous>, transform_indices = @transform_0, window_bounds = array<i64: 16, 32>}, {transform_indices = @transform_1, window_bounds = array<i64: 32, 128>}, {transform_indices = @transform_2, window_bounds = array<i64: 1, 128>}, {transform_indices = @transform_3, window_bounds = array<i64: 16, 128>}]} {
    %c0 = arith.constant 0 : index
    %c0_0 = arith.constant 0 : index
    %0 = vector.load %arg1[%c0, %c0_0] : memref<16x32xbf16, #tpu.memory_space<vmem>>, vector<16x32xbf16>
    %c0_1 = arith.constant 0 : index
    %c0_2 = arith.constant 0 : index
    %1 = vector.load %arg2[%c0_1, %c0_2] : memref<32x128xbf16, #tpu.memory_space<vmem>>, vector<32x128xbf16>
    %cst = arith.constant dense<0.000000e+00> : vector<16x128xf32>
    %2 = tpu.matmul %0, %1, %cst {dimension_numbers = #tpu.dot_dimension_numbers<[1], [0], [0], [1], [0, 0, 1, 1], [], []>} : vector<16x32xbf16>, vector<32x128xbf16>, vector<16x128xf32> -> vector<16x128xf32>
    %c0_3 = arith.constant 0 : index
    %c0_4 = arith.constant 0 : index
    %3 = vector.load %arg3[%c0_3, %c0_4] : memref<1x128xf32, #tpu.memory_space<vmem>>, vector<1x128xf32>
    %4 = vector.broadcast %3 : vector<1x128xf32> to vector<16x128xf32>
    %5 = arith.addf %2, %4 : vector<16x128xf32>
    %c0_5 = arith.constant 0 : index
    %c0_6 = arith.constant 0 : index
    %6 = vector.load %arg4[%c0_5, %c0_6] : memref<16x128xf32, #tpu.memory_space<vmem>>, vector<16x128xf32>
    tpu.vector_store %arg4[%c0_5, %c0_6], %5 {strides = array<i32>} : memref<16x128xf32, #tpu.memory_space<vmem>>, vector<16x128xf32>,
    return
  }
  func.func @transform_0(%arg0: i32) -> (i32, i32) {
    %c0_i32 = arith.constant 0 : i32
    %c0_i32_0 = arith.constant 0 : i32
    %c0_i32_1 = arith.constant 0 : i32
    return %c0_i32, %c0_i32_0 : i32, i32
  }
  func.func @transform_1(%arg0: i32) -> (i32, i32) {
    %c0_i32 = arith.constant 0 : i32
    %c0_i32_0 = arith.constant 0 : i32
    return %c0_i32, %arg0 : i32, i32
  }
  func.func @transform_2(%arg0: i32) -> (i32, i32) {
    %c0_i32 = arith.constant 0 : i32
    %c0_i32_0 = arith.constant 0 : i32
    return %c0_i32, %arg0 : i32, i32
  }
  func.func @transform_3(%arg0: i32) -> (i32, i32) {
    %c0_i32 = arith.constant 0 : i32
    %c0_i32_0 = arith.constant 0 : i32
    return %c0_i32, %arg0 : i32, i32
  }
}

</mosaic_0001>

<bundles_post_ra>
// kernel: tpu_custom_call.1
= control target key start
LH: loop header
LB: loop body
LE: loop exit
PB: predicated region body
PF: predicated region fallthrough
CT: control target
= control target key end

     0   :  { %8 = vsyncpa [#allocation3], 0  ;;  %s872_s0 = inlined_call_operand.hbm [shape: bf16[16,32], index: 0, kind: input, shape index: {}]   ;;  %s873_s1 = inlined_call_operand.hbm [shape: bf16[32,256], index: 1, kind: input, shape index: {}]   ;;  %s874_s2 = inlined_call_operand.hbm [shape: f32[1,256], index: 2, kind: input, shape index: {}]   ;;  %s875_s3 = inlined_call_operand.hbm [shape: f32[16,256], index: 3, kind: output, shape index: {}]  }
   0x1   :  { %9 = vsyncpa [#allocation6], 0 }
   0x2   :  { %11 = vsyncpa [#allocation6 + $0x1], 0 }
   0x3   :  { %12 = vsyncpa [#allocation4], 0 }
   0x4   :  { %14 = vsyncpa [#allocation4 + $0x1], 0  ;;  %s691_s12 = smov 0   ;;  %s693_s13 = smov 0  }
   0x5   :  { %s695_s14 = smov 0   ;;  %s697_s15 = smov 0  }
   0x6 LB: > { %s712_s16 = sadd.s32 1, %s662_s15   ;;  %s48_s17 = sadd.s32 1, %s658_s14  ;;  %s662_s15 = sphi %s697_s15, %s889_s15   ;;  %s658_s14 = sphi %s695_s14, %s888_s14   ;;  %s654_s13 = sphi %s693_s13, %s887_s13   ;;  %s650_s12 = sphi %s691_s12, %s886_s12  }
   0x7   : > { %s45_s18 = ssub.s32 %s662_s15, %s712_s16  ;;  %p55_p0 = scmp.ne.s32.totalorder %s658_s14, %s654_s13 }
   0x8   : > { %p46_p1 = scmp.eq.s32.totalorder %s45_s18, 0  ;;  %p56_p2 = scmp.eq.s32.totalorder %s662_s15, 0 }
   0x9   : > { %p459_p5 = scmp.lt.s32.totalorder %s662_s15, 2  ;;  %s151_s21 = sand.u32 1, %s662_s15  }
   0xa   : > { %s721_s19 = scalar_select %p46_p1, %s658_s14, %s48_s17  }
   0xb   : > { %p726_p3 = por %p56_p2, %p55_p0  ;;  %s153_s22 = sand.u32 1, %s658_s14  }
   0xc   : > { %s407_s23 = sshll.u32 %s153_s22, 4  ;;  %s408_s24 = sshll.u32 %s662_s15, 2 }
   0xd   : > { %s159_s27 = scalar_lea.hbm %s873_s1, %s408_s24  ;;  %s155_s29 = scalar_lea.vmem [#allocation5], %s407_s23 }
   0xe   : > { %s160_s28 = sshll.u32 %s159_s27, 4  ;;  %s162_s30 = sshll.u32 %s155_s29, 4  ;;  %s161_s28 = int_to_ptr.hbm [resolvable:$true] %s160_s28  ;;  %s163_s30 = int_to_ptr.vmem [resolvable:$true] %s162_s30 }
   0xf   : > { %p742_p6 = pnand %p459_p5, %p726_p3  ;;  %s747_s5 = sadd.s32 4294967295, %s662_s15  }
  0x10   : > { %s749_s6 = scalar_lea.sflag [#allocation6], %s151_s21  ;;  %s502_s7 = sshra.s32 %s161_s28, 4  ;;  %s503_s7 = int_to_ptr.hbm [resolvable:$true] %s502_s7 }
  0x11   : > { %s504_s8 = scalar_lea.hbm %s503_s7, 16  ;;  %p506_p8 = pneg %p742_p6 }
  0x12   : > { %p505_p7 = scmp.ne.s32.totalorder %s503_s7, %s504_s8  ;;  %s509_s11 = scalar_lea.hbm %s873_s1, 32 }
  0x13   : > { %p510_p11 = scmp.lt.s32.totalorder %s503_s7, %s873_s1  ;;  %p511_p12 = scmp.lt.s32.totalorder %s509_s11, %s504_s8 }
  0x14   : > { %p507_p9 = pnand %p506_p8, %p505_p7 }
  0x15   : > { %p512_p13 = por %p511_p12, %p510_p11 }
  0x16   : > { %p508_p10 = pneg %p507_p9 }
  0x18   : > { %p513_p1 = pnand %p512_p13, %p508_p10 }
  0x1a   : > { %516 = shalt.err (!%p513_p1)
}
  0x1b   : > { %s664_s20 = smov 128   ;;  %s665_s21 = smov 64  }
  0x1c   : > { %s666_s23 = smov 4   ;;  %s403_s24 = sadd.s32 4294967294, %s662_s15  }
  0x1d   : > { %450 = dma.hbm_to_vmem [thread:$0]  (!%p742_p6), %s161_s28, 256, %s163_s30, %s749_s6, %s664_s20, %s665_s21, %s666_s23  }
  0x1e   : > { %p61_p2 = scmp.ne.s32.totalorder %s654_s13, %s650_s12  ;;  %p876_p3 = scmp.eq.s32.totalorder %s747_s5, 0 }
  0x1f   : > { %p111_p5 = scmp.eq.s32.totalorder %s747_s5, 1  ;;  %p117_p7 = scmp.eq.s32.totalorder %s403_s24, 1 }
  0x20   : > { %p404_p9 = scmp.ge.s32.totalorder %s662_s15, 1  ;;  %p775_p10 = por %p876_p3, %p61_p2 }
  0x21   : > { %p782_p11 = por %p111_p5, %p55_p0  ;;  %p786_p12 = por %p117_p7, %p61_p2 }
  0x22   : > { %p124_p13 = scmp.lt.s32.totalorder %s662_s15, 3  ;;  %s135_s30 = sshll.u32 %s872_s0, 4  ;;  %s136_s30 = int_to_ptr.hbm [resolvable:$true] %s135_s30 }
  0x23   : > { %s667_s8 = smov [#allocation2]   ;;  %s178_s17 = scalar_lea.hbm %s874_s2, %s662_s15 }
  0x24   : > { %p794_p1 = pnand %p404_p9, %p124_p13  ;;  %s137_s9 = sshll.u32 %s667_s8, 4  ;;  %s138_s9 = int_to_ptr.vmem [resolvable:$true] %s137_s9 }
  0x25   : > { %s180_s18 = sshll.u32 %s178_s17, 4  ;;  %s175_s20 = scalar_lea.vmem [#allocation7], %s153_s22  ;;  %s181_s18 = int_to_ptr.hbm [resolvable:$true] %s180_s18 }
  0x26   : > { %p443_p0 = pneg %p794_p1  ;;  %s182_s24 = sshll.u32 %s175_s20, 4  ;;  %s183_s24 = int_to_ptr.vmem [resolvable:$true] %s182_s24 }
  0x27   : > { %s562_s28 = sshra.s32 %s181_s18, 4  ;;  %s569_s11 = scalar_lea.hbm %s874_s2, 2  ;;  %s563_s28 = int_to_ptr.hbm [resolvable:$true] %s562_s28 }
  0x28   : > { %p444_p2 = pnand %p443_p0, %p876_p3  ;;  %s564_s29 = scalar_lea.hbm %s563_s28, 1 }
  0x29   : > { %p565_p5 = scmp.ne.s32.totalorder %s563_s28, %s564_s29  ;;  %p570_p13 = scmp.lt.s32.totalorder %s563_s28, %s874_s2 }
  0x2a   : > { %446 = dma.hbm_to_vmem [thread:$0]  (!%p444_p2), %s136_s30, 128, %s138_s9, [#allocation3], %s665_s21, %s665_s21, %s666_s23  }
  0x2b   : > { %p567_p7 = pnand %p565_p5, %p506_p8  ;;  %p571_p0 = scmp.lt.s32.totalorder %s569_s11, %s564_s29 }
  0x2d   : > { %p568_p9 = pneg %p567_p7  ;;  %p572_p4 = por %p571_p0, %p570_p13 }
  0x2f   : > { %p573_p3 = pnand %p572_p4, %p568_p9 }
  0x31   : > { %576 = shalt.err (!%p573_p3)
}
  0x32   : > { %453 = dma.hbm_to_vmem [thread:$0]  (!%p742_p6), %s181_s18, 16, %s183_s24, %s749_s6  }
  0x33   : > { %191 = sbr.rel (%p794_p1) target bundleno = 210 (0xd2), region = 32  ;;  %p883_p8 = scmp.eq.s32.totalorder (!%p794_p1), %s747_s5, 0 }
  0x38   : > { %637 = dma.done.wait (%p883_p8), [#allocation3], 128   ;;  %p884_p2 = pmov %p883_p8 }
  0x39   : > { %s198_s21 = sand.u32 1, %s747_s5   ;;  %s831_s23 = sand.u32 1, %s654_s13  }
  0x3a   : > { %639 = vsyncadd (%p884_p2), [#allocation3], 4294967168  ;;  %s411_s30 = sshll.u32 %s831_s23, 4  ;;  %s199_s4 = scalar_lea.sflag [#allocation6], %s198_s21 }
  0x3b   : > { %s202_s9 = scalar_lea.vmem [#allocation5], %s411_s30 }
  0x3c   : > { %641 = dma.done.wait (%p775_p10), %s199_s4, 272  }
  0x3d   : > { %643 = vsyncadd (%p775_p10), %s199_s4, 4294967024  ;;  %v432_v0 = vld [vmem:[%s202_s9 + $0x8] sm:$0xff]  ;;  %s211_s6 = scalar_lea.vmem [#allocation7], %s831_s23  ;;  %v431_v1 = vld [vmem:[%s202_s9] sm:$0xff]  ;;  %vm267_vm0 = vcmask 261120   ;;  %s427_s7 = sshll.u32 %s747_s5, 3 }
  0x3e   : > { %277 = vmatpush.bf16.msra.mxu0 %v432_v0  ;;  %v430_v2 = vld [vmem:[#allocation2] sm:$0xff]  ;;  %s298_s25 = scalar_lea.hbm %s875_s3, %s427_s7  ;;  %s238_s24 = scalar_lea.vmem [#allocation8], %s411_s30 }
  0x3f   : > { %v501_v3 = vld [vmem:[%s211_s6] ss:$0 sm:$0xff]  ;;  %s299_s28 = sshll.u32 %s238_s24, 4  ;;  %s301_s29 = sshll.u32 %s298_s25, 4  ;;  %s300_s28 = int_to_ptr.vmem [resolvable:$true] %s299_s28  ;;  %s302_s29 = int_to_ptr.hbm [resolvable:$true] %s301_s29 }
  0x40   : > { %s288_s8 = scalar_lea.sflag [#allocation4], %s831_s23  ;;  %s606_s10 = sshra.s32 %s302_s29, 4  ;;  %s607_s10 = int_to_ptr.hbm [resolvable:$true] %s606_s10 }
  0x41   : > { %s608_s5 = scalar_lea.hbm %s607_s10, 16  ;;  %s612_s22 = scalar_lea.hbm %s875_s3, 32 }
  0x42   : > { %278 = vmatpush.bf16.msra.mxu0 %v431_v1  ;;  %p609_p4 = scmp.ne.s32.totalorder %s607_s10, %s608_s5  ;;  %p613_p10 = scmp.lt.s32.totalorder %s607_s10, %s875_s3 }
  0x43   : > { %p614_p1 = scmp.lt.s32.totalorder %s612_s22, %s608_s5 }
  0x44   : > { %p610_p6 = pnand %p609_p4, %p782_p11 }
  0x45   : > { %425 = vmatmul.msk.bf16.vlgmr.msra.gmra.mxu0 %vm267_vm0, %v430_v2  ;;  %p615_p5 = por %p614_p1, %p613_p10 }
  0x46   : > { %p611_p3 = pneg %p610_p6 }
  0x48   : > { %p616_p7 = pnand %p615_p5, %p611_p3 }
  0xc2   : > { %v280_v4 = vpop.f32.mrf.mxu0 }
  0xc3   : > { %v281_v5 = vadd.f32 %v501_v3, %v280_v4 }
  0xc5   : > { %285 = vst [vmem:[%s238_s24] sm:$0xff] %v281_v5 }
  0xca   : > { %v282_v6 = vpop.f32.mrf.mxu0 }
  0xcb   : > { %v283_v7 = vadd.f32 %v501_v3, %v282_v6 }
  0xcd   : > { %286 = vst [vmem:[%s238_s24 + $0x8] sm:$0xff] %v283_v7 }
  0xce   : > { %619 = shalt.err (!%p616_p7)
}
  0xcf   : > { %s668_s23 = smov 128   ;;  %s669_s4 = smov 256  }
  0xd0   : > { %s670_s9 = smov 8  }
  0xd1   : > { %441 = dma.vmem_to_hbm [thread:$0]  (%p782_p11), %s300_s28, 256, %s302_s29, %s288_s8, %s668_s23, %s669_s4, %s670_s9  }
  0xd2 PF: > { %s316_s6 = sand.u32 1, %s650_s12   ;;  %p885_p9 = scmp.ge.s32.totalorder %s662_s15, 2 }
  0xd3   : > { %s317_s7 = scalar_lea.sflag [#allocation4], %s316_s6 }
  0xd4   : > { %p455_p13 = pnand %p885_p9, %p786_p12 }
  0xd6   : > { %p456_p0 = pneg %p455_p13 }
  0xd8   : > { %645 = dma.done.wait (%p456_p0), %s317_s7, 256  }
  0xd9   : > { %647 = vsyncadd (%p456_p0), %s317_s7, 4294967040  ;;  %p17_p8 = scmp.ge.s32.totalorder %s712_s16, 4   ;;  %s886_s12 = smov %s654_s13 }
  0xda   : > { %s887_s13 = smov %s658_s14  ;;  %s888_s14 = smov %s721_s19 }
  0xdb   : > { %s889_s15 = smov %s712_s16  ;;  %19 = sbr.rel (!%p17_p8) target bundleno = 6 (0x6), region = 93 }
  0xe0   :  { %323 = vsyncpa [#allocation3], 1 }
  0xe1   :  { %325 = vsyncpa [#allocation3 + $0x1], 1 }
  0xe2   :  { %326 = vsyncpa [#allocation6], 1 }
  0xe3   :  { %328 = vsyncpa [#allocation6 + $0x1], 1 }
  0xe4   :  { %329 = vsyncpa [#allocation4], 1 }
  0xe5   :  { %331 = vsyncpa [#allocation4 + $0x1], 1 }

</bundles_post_ra>
